<compile_context>
chip_gen: v5e
topology: v5e:2x2
jax: 0.10.0
libtpu: 0.0.40
codegen_flags: <defaults>
</compile_context>

<pallas_src>
import math
import functools

import jax
import jax.numpy as jnp
from jax.experimental import pallas as pl
from jax.experimental.pallas import tpu as pltpu


def _ceil_to(x, m):
    return ((x + m - 1) // m) * m


def _vmem_capacity_bytes():
    """Best-effort per-core VMEM capacity; conservative fallback (v7x = 64 MiB)."""
    try:
        info = pltpu.get_tpu_info()
        return int(getattr(info, "vmem_capacity_bytes", 64 * 1024 * 1024))
    except Exception:
        return 64 * 1024 * 1024


def _select_defaults():
    """Generation-aware default tiles and VMEM ceiling."""
    try:
        kind = jax.devices()[0].device_kind.lower()
    except Exception:
        kind = ""
    big_vmem = _vmem_capacity_bytes() >= 96 * 1024 * 1024
    if "v6" in kind and big_vmem:
        # v6e: needs ~650 flop/B -> biggest tiles; 128 MiB physical VMEM.
        return 2048, 1024, 1024, 100 * 1024 * 1024
    if big_vmem:
        # v5e-class (128 MiB): ~240 flop/B threshold; modest tiles already compute-bound.
        return 1024, 512, 1024, 96 * 1024 * 1024
    # v7x-class: 64 MiB per TensorCore -> leave headroom for Mosaic internal scratch.
    return 1024, 512, 1024, 48 * 1024 * 1024


def _geglu_kernel(x_ref, wv_ref, wg_ref, bv_ref, bg_ref, o_ref, acc_v, acc_g):
    # grid = (M tiles, N tiles, K tiles); K is the innermost reduction axis.
    k = pl.program_id(2)

    xb = x_ref[...]
    dv = jnp.dot(xb, wv_ref[...], preferred_element_type=jnp.float32)
    dg = jnp.dot(xb, wg_ref[...], preferred_element_type=jnp.float32)

    # Fold bias + accumulator init into the first K step (no zero-store / extra adds).
    @pl.when(k == 0)
    def _init():
        acc_v[...] = dv + bv_ref[...].astype(jnp.float32)
        acc_g[...] = dg + bg_ref[...].astype(jnp.float32)

    @pl.when(k != 0)
    def _accum():
        acc_v[...] += dv
        acc_g[...] += dg

    @pl.when(k == pl.num_programs(2) - 1)
    def _finalize():
        gate = acc_g[...]
        # Exact GELU (matches torch.nn.functional.gelu default, approximate='none').
        # TODO(synk): tanh-approx GELU (EUP slot) if torch parity can be relaxed.
        gelu_gate = 0.5 * gate * (1.0 + jax.lax.erf(gate * (1.0 / math.sqrt(2.0))))
        o_ref[...] = (acc_v[...] * gelu_gate).astype(o_ref.dtype)


@functools.partial(
    jax.jit, static_argnames=("tm", "tn", "tk", "vmem_ceiling", "cast_bf16"))
def _geglu_impl(x, w, b, *, tm, tn, tk, vmem_ceiling, cast_bf16):
    B, S, dim_in = x.shape
    d_out = w.shape[1] // 2
    M = B * S
    out_dtype = x.dtype

    if cast_bf16:
        # Halves HBM traffic / VMEM; accumulation stays f32 in the kernel.
        x = x.astype(jnp.bfloat16)
        w = w.astype(jnp.bfloat16)

    # Align requested tiles to hardware granularity (8 sublanes, 128 lanes).
    tm = _ceil_to(tm, 8)
    tn = _ceil_to(tn, 128)
    tk = _ceil_to(tk, 128)

    # Effective tiles never exceed the (aligned) problem size.
    tm_e = min(tm, _ceil_to(M, 8))
    tn_e = min(tn, _ceil_to(d_out, 128))
    tk_e = min(tk, _ceil_to(dim_in, 128))

    M_pad = _ceil_to(M, tm_e)
    N_pad = _ceil_to(d_out, tn_e)
    K_pad = _ceil_to(dim_in, tk_e)

    # Split the fused projection into val / gate operands (lane-dense blocks).
    w_val = w[:, :d_out]
    w_gate = w[:, d_out:]
    b_val = b[:d_out].reshape(1, d_out)
    b_gate = b[d_out:].reshape(1, d_out)

    x2d = x.reshape(M, dim_in)
    if (M_pad, K_pad) != (M, dim_in):
        x2d = jnp.pad(x2d, ((0, M_pad - M), (0, K_pad - dim_in)))
    if (K_pad, N_pad) != (dim_in, d_out):
        w_val = jnp.pad(w_val, ((0, K_pad - dim_in), (0, N_pad - d_out)))
        w_gate = jnp.pad(w_gate, ((0, K_pad - dim_in), (0, N_pad - d_out)))
    if N_pad != d_out:
        b_val = jnp.pad(b_val, ((0, 0), (0, N_pad - d_out)))
        b_gate = jnp.pad(b_gate, ((0, 0), (0, N_pad - d_out)))

    grid = (M_pad // tm_e, N_pad // tn_e, K_pad // tk_e)

    # Double-buffered VMEM footprint estimate -> generation-aware scoped limit.
    in_item = jnp.dtype(x2d.dtype).itemsize
    out_item = jnp.dtype(out_dtype).itemsize
    est = (2 * tm_e * tk_e * in_item            # x tile (double-buffered)
           + 2 * 2 * tk_e * tn_e * in_item      # two weight K-slabs (double-buffered)
           + 2 * tm_e * tn_e * out_item         # output tile (double-buffered)
           + 2 * tm_e * tn_e * 4                # two f32 accumulators
           + 2 * 2 * tn_e * jnp.dtype(b.dtype).itemsize)  # bias tiles
    vmem_limit = int(min(max(int(est * 1.25), 32 * 1024 * 1024), vmem_ceiling))

    out2d = pl.pallas_call(
        _geglu_kernel,
        out_shape=jax.ShapeDtypeStruct((M_pad, N_pad), out_dtype),
        grid_spec=pltpu.PrefetchScalarGridSpec(
            num_scalar_prefetch=0,
            grid=grid,
            in_specs=[
                pl.BlockSpec((tm_e, tk_e), lambda i, j, k: (i, k)),   # x
                pl.BlockSpec((tk_e, tn_e), lambda i, j, k: (k, j)),   # w_val
                pl.BlockSpec((tk_e, tn_e), lambda i, j, k: (k, j)),   # w_gate
                pl.BlockSpec((1, tn_e), lambda i, j, k: (0, j)),      # b_val
                pl.BlockSpec((1, tn_e), lambda i, j, k: (0, j)),      # b_gate
            ],
            out_specs=pl.BlockSpec((tm_e, tn_e), lambda i, j, k: (i, j)),
            scratch_shapes=[
                pltpu.VMEM((tm_e, tn_e), jnp.float32),
                pltpu.VMEM((tm_e, tn_e), jnp.float32),
            ],
        ),
        compiler_params=pltpu.CompilerParams(
            dimension_semantics=("parallel", "parallel", "arbitrary"),
            vmem_limit_bytes=vmem_limit,
        ),
    )(x2d, w_val, w_gate, b_val, b_gate)

    return out2d[:M, :d_out].reshape(B, S, d_out)


def geglu(x, w, b, *, tm=None, tn=None, tk=None, cast_bf16=False):
    """GEGLU forward.

    x: (B, S, dim_in)
    w: (dim_in, 2*dim_out)  -- transpose of PyTorch nn.Linear weight
    b: (2*dim_out,)
    returns (B, S, dim_out)
    """
    d_tm, d_tn, d_tk, ceiling = _select_defaults()
    tm = d_tm if tm is None else tm
    tn = d_tn if tn is None else tn
    tk = d_tk if tk is None else tk
    return _geglu_impl(x, w, b, tm=tm, tn=tn, tk=tk,
                       vmem_ceiling=ceiling, cast_bf16=cast_bf16)


def geglu_ref(x, w, b):
    h = jnp.einsum("bsd,dk->bsk", x.astype(jnp.float32), w.astype(jnp.float32))
    h = h + b.astype(jnp.float32)
    d_out = w.shape[1] // 2
    val, gate = h[..., :d_out], h[..., d_out:]
    out = val * 0.5 * gate * (1.0 + jax.lax.erf(gate / math.sqrt(2.0)))
    return out.astype(x.dtype)


if __name__ == "__main__":
    batch, seq, dim_in, dim_out = 2, 8, 32, 32

    key = jax.random.PRNGKey(0)
    kx, kw, kb = jax.random.split(key, 3)

    x = jax.random.normal(kx, (batch, seq, dim_in), dtype=jnp.float32)
    # nn.Linear(dim_in, dim_out*2) params, weight transposed to (dim_in, 2*dim_out).
    w = jax.random.normal(kw, (dim_in, 2 * dim_out), dtype=jnp.float32) * (1.0 / math.sqrt(dim_in))
    b = jax.random.normal(kb, (2 * dim_out,), dtype=jnp.float32) * 0.01

    # f32 path (exact torch semantics)
    out = geglu(x, w, b)
    jax.block_until_ready(out)
    ref = geglu_ref(x, w, b)
    assert out.shape == (batch, seq, dim_out)
    assert jnp.allclose(out, ref, atol=1e-4, rtol=1e-4), "f32 mismatch vs reference"

    # bf16 input path (exercises the f32-acc -> bf16 epilogue cast)
    xb = x.astype(jnp.bfloat16)
    wb = w.astype(jnp.bfloat16)
    bb = b.astype(jnp.bfloat16)
    out_bf16 = geglu(xb, wb, bb)
    jax.block_until_ready(out_bf16)
    ref_bf16 = geglu_ref(xb, wb, bb)
    assert out_bf16.shape == (batch, seq, dim_out)
    assert jnp.allclose(out_bf16.astype(jnp.float32), ref_bf16.astype(jnp.float32),
                        atol=2e-2, rtol=2e-2), "bf16 mismatch vs reference"

    print("KERNEL_OK")
</pallas_src>

<mosaic_0001>
module attributes {stable_mosaic.version = 11 : i64} {
  func.func @_geglu_kernel(%arg0: i32, %arg1: i32, %arg2: i32, %arg3: memref<16x128xf32, #tpu.memory_space<vmem>>, %arg4: memref<128x128xf32, #tpu.memory_space<vmem>>, %arg5: memref<128x128xf32, #tpu.memory_space<vmem>>, %arg6: memref<1x128xf32, #tpu.memory_space<vmem>>, %arg7: memref<1x128xf32, #tpu.memory_space<vmem>>, %arg8: memref<16x128xf32, #tpu.memory_space<vmem>>, %arg9: memref<16x128xf32, #tpu.memory_space<vmem>>, %arg10: memref<16x128xf32, #tpu.memory_space<vmem>>) attributes {dimension_semantics = [#tpu.dimension_semantics<parallel>, #tpu.dimension_semantics<parallel>, #tpu.dimension_semantics<arbitrary>], iteration_bounds = array<i64: 1, 1, 1>, scalar_prefetch = 0 : i64, scratch_operands = 2 : i64, tpu.core_type = #tpu.core_type<tc>, window_params = [{transform_indices = @transform_0, window_bounds = array<i64: 16, 128>}, {transform_indices = @transform_1, window_bounds = array<i64: 128, 128>}, {transform_indices = @transform_2, window_bounds = array<i64: 128, 128>}, {transform_indices = @transform_3, window_bounds = array<i64: 1, 128>}, {transform_indices = @transform_4, window_bounds = array<i64: 1, 128>}, {transform_indices = @transform_5, window_bounds = array<i64: 16, 128>}]} {
    %c0 = arith.constant 0 : index
    %c0_0 = arith.constant 0 : index
    %0 = vector.load %arg3[%c0, %c0_0] : memref<16x128xf32, #tpu.memory_space<vmem>>, vector<16x128xf32>
    %c0_1 = arith.constant 0 : index
    %c0_2 = arith.constant 0 : index
    %1 = vector.load %arg4[%c0_1, %c0_2] : memref<128x128xf32, #tpu.memory_space<vmem>>, vector<128x128xf32>
    %cst = arith.constant dense<0.000000e+00> : vector<16x128xf32>
    %2 = tpu.matmul %0, %1, %cst {dimension_numbers = #tpu.dot_dimension_numbers<[1], [0], [0], [1], [0, 0, 1, 1], [], []>} : vector<16x128xf32>, vector<128x128xf32>, vector<16x128xf32> -> vector<16x128xf32>
    %c0_3 = arith.constant 0 : index
    %c0_4 = arith.constant 0 : index
    %3 = vector.load %arg5[%c0_3, %c0_4] : memref<128x128xf32, #tpu.memory_space<vmem>>, vector<128x128xf32>
    %cst_5 = arith.constant dense<0.000000e+00> : vector<16x128xf32>
    %4 = tpu.matmul %0, %3, %cst_5 {dimension_numbers = #tpu.dot_dimension_numbers<[1], [0], [0], [1], [0, 0, 1, 1], [], []>} : vector<16x128xf32>, vector<128x128xf32>, vector<16x128xf32> -> vector<16x128xf32>
    %c0_i32 = arith.constant 0 : i32
    %5 = arith.cmpi eq, %arg2, %c0_i32 : i32
    %6 = arith.extui %5 : i1 to i32
    %c0_i32_6 = arith.constant 0 : i32
    %7 = arith.cmpi ne, %6, %c0_i32_6 : i32
    scf.if %7 {
      %c0_11 = arith.constant 0 : index
      %c0_12 = arith.constant 0 : index
      %14 = vector.load %arg6[%c0_11, %c0_12] : memref<1x128xf32, #tpu.memory_space<vmem>>, vector<1x128xf32>
      %15 = vector.broadcast %14 : vector<1x128xf32> to vector<16x128xf32>
      %16 = arith.addf %2, %15 : vector<16x128xf32>
      %c0_13 = arith.constant 0 : index
      %c0_14 = arith.constant 0 : index
      %17 = vector.load %arg9[%c0_13, %c0_14] : memref<16x128xf32, #tpu.memory_space<vmem>>, vector<16x128xf32>
      tpu.vector_store %arg9[%c0_13, %c0_14], %16 {strides = array<i32>} : memref<16x128xf32, #tpu.memory_space<vmem>>, vector<16x128xf32>,
      %c0_15 = arith.constant 0 : index
      %c0_16 = arith.constant 0 : index
      %18 = vector.load %arg7[%c0_15, %c0_16] : memref<1x128xf32, #tpu.memory_space<vmem>>, vector<1x128xf32>
      %19 = vector.broadcast %18 : vector<1x128xf32> to vector<16x128xf32>
      %20 = arith.addf %4, %19 : vector<16x128xf32>
      %c0_17 = arith.constant 0 : index
      %c0_18 = arith.constant 0 : index
      %21 = vector.load %arg10[%c0_17, %c0_18] : memref<16x128xf32, #tpu.memory_space<vmem>>, vector<16x128xf32>
      tpu.vector_store %arg10[%c0_17, %c0_18], %20 {strides = array<i32>} : memref<16x128xf32, #tpu.memory_space<vmem>>, vector<16x128xf32>,
    } else {
    }
    %c0_i32_7 = arith.constant 0 : i32
    %8 = arith.cmpi ne, %arg2, %c0_i32_7 : i32
    %9 = arith.extui %8 : i1 to i32
    %c0_i32_8 = arith.constant 0 : i32
    %10 = arith.cmpi ne, %9, %c0_i32_8 : i32
    scf.if %10 {
      %c0_11 = arith.constant 0 : index
      %c0_12 = arith.constant 0 : index
      %14 = vector.load %arg9[%c0_11, %c0_12] : memref<16x128xf32, #tpu.memory_space<vmem>>, vector<16x128xf32>
      %15 = arith.addf %14, %2 : vector<16x128xf32>
      %c0_13 = arith.constant 0 : index
      %c0_14 = arith.constant 0 : index
      %16 = vector.load %arg9[%c0_13, %c0_14] : memref<16x128xf32, #tpu.memory_space<vmem>>, vector<16x128xf32>
      tpu.vector_store %arg9[%c0_13, %c0_14], %15 {strides = array<i32>} : memref<16x128xf32, #tpu.memory_space<vmem>>, vector<16x128xf32>,
      %c0_15 = arith.constant 0 : index
      %c0_16 = arith.constant 0 : index
      %17 = vector.load %arg10[%c0_15, %c0_16] : memref<16x128xf32, #tpu.memory_space<vmem>>, vector<16x128xf32>
      %18 = arith.addf %17, %4 : vector<16x128xf32>
      %c0_17 = arith.constant 0 : index
      %c0_18 = arith.constant 0 : index
      %19 = vector.load %arg10[%c0_17, %c0_18] : memref<16x128xf32, #tpu.memory_space<vmem>>, vector<16x128xf32>
      tpu.vector_store %arg10[%c0_17, %c0_18], %18 {strides = array<i32>} : memref<16x128xf32, #tpu.memory_space<vmem>>, vector<16x128xf32>,
    } else {
    }
    %c0_i32_9 = arith.constant 0 : i32
    %11 = arith.cmpi eq, %arg2, %c0_i32_9 : i32
    %12 = arith.extui %11 : i1 to i32
    %c0_i32_10 = arith.constant 0 : i32
    %13 = arith.cmpi ne, %12, %c0_i32_10 : i32
    scf.if %13 {
      %c0_11 = arith.constant 0 : index
      %c0_12 = arith.constant 0 : index
      %14 = vector.load %arg10[%c0_11, %c0_12] : memref<16x128xf32, #tpu.memory_space<vmem>>, vector<16x128xf32>
      %cst_13 = arith.constant 5.000000e-01 : f32
      %15 = vector.broadcast %cst_13 : f32 to vector<16x128xf32>
      %16 = arith.mulf %15, %14 : vector<16x128xf32>
      %cst_14 = arith.constant 0.707106769 : f32
      %17 = vector.broadcast %cst_14 : f32 to vector<16x128xf32>
      %18 = arith.mulf %14, %17 : vector<16x128xf32>
      %19 = math.erf %18 : vector<16x128xf32>
      %cst_15 = arith.constant 1.000000e+00 : f32
      %20 = vector.broadcast %cst_15 : f32 to vector<16x128xf32>
      %21 = arith.addf %20, %19 : vector<16x128xf32>
      %22 = arith.mulf %16, %21 : vector<16x128xf32>
      %c0_16 = arith.constant 0 : index
      %c0_17 = arith.constant 0 : index
      %23 = vector.load %arg9[%c0_16, %c0_17] : memref<16x128xf32, #tpu.memory_space<vmem>>, vector<16x128xf32>
      %24 = arith.mulf %23, %22 : vector<16x128xf32>
      %c0_18 = arith.constant 0 : index
      %c0_19 = arith.constant 0 : index
      %25 = vector.load %arg8[%c0_18, %c0_19] : memref<16x128xf32, #tpu.memory_space<vmem>>, vector<16x128xf32>
      tpu.vector_store %arg8[%c0_18, %c0_19], %24 {strides = array<i32>} : memref<16x128xf32, #tpu.memory_space<vmem>>, vector<16x128xf32>,
    } else {
    }
    return
  }
  func.func @transform_0(%arg0: i32, %arg1: i32, %arg2: i32) -> (i32, i32) {
    %c0_i32 = arith.constant 0 : i32
    return %arg0, %arg2 : i32, i32
  }
  func.func @transform_1(%arg0: i32, %arg1: i32, %arg2: i32) -> (i32, i32) {
    %c0_i32 = arith.constant 0 : i32
    return %arg2, %arg1 : i32, i32
  }
  func.func @transform_2(%arg0: i32, %arg1: i32, %arg2: i32) -> (i32, i32) {
    %c0_i32 = arith.constant 0 : i32
    return %arg2, %arg1 : i32, i32
  }
  func.func @transform_3(%arg0: i32, %arg1: i32, %arg2: i32) -> (i32, i32) {
    %c0_i32 = arith.constant 0 : i32
    %c0_i32_0 = arith.constant 0 : i32
    return %c0_i32, %arg1 : i32, i32
  }
  func.func @transform_4(%arg0: i32, %arg1: i32, %arg2: i32) -> (i32, i32) {
    %c0_i32 = arith.constant 0 : i32
    %c0_i32_0 = arith.constant 0 : i32
    return %c0_i32, %arg1 : i32, i32
  }
  func.func @transform_5(%arg0: i32, %arg1: i32, %arg2: i32) -> (i32, i32) {
    %c0_i32 = arith.constant 0 : i32
    return %arg0, %arg1 : i32, i32
  }
}

</mosaic_0001>

<bundles_post_ra>
// kernel: _geglu_impl.1
= control target key start
LH: loop header
LB: loop body
LE: loop exit
PB: predicated region body
PF: predicated region fallthrough
CT: control target
= control target key end

     0   :  { %s436_s2 = inlined_call_operand.vmem [shape: f32[128,128], index: 2, kind: input, shape index: {}]   ;;  %s437_s1 = inlined_call_operand.vmem [shape: f32[128,128], index: 1, kind: input, shape index: {}]   ;;  %s438_s4 = inlined_call_operand.vmem [shape: f32[1,128], index: 4, kind: input, shape index: {}]   ;;  %s439_s0 = inlined_call_operand.vmem [shape: f32[16,128], index: 0, kind: input, shape index: {}]   ;;  %s440_s3 = inlined_call_operand.vmem [shape: f32[1,128], index: 3, kind: input, shape index: {}]   ;;  %s441_s5 = inlined_call_operand.vmem [shape: f32[16,128], index: 5, kind: output, shape index: {}]  }
   0x1   :  { %v76_v0 = vld [vmem:[%s436_s2 + $0x78] sm:$0xff]  ;;  %v75_v1 = vld [vmem:[%s436_s2 + $0x70] sm:$0xff]  ;;  %v74_v2 = vld [vmem:[%s436_s2 + $0x68] sm:$0xff] }
   0x2   :  { %77 = vmatpush.msra.mxu1 %v76_v0  ;;  %257 = vmatpush.msra.mxu3 %v76_v0  ;;  %v73_v3 = vld [vmem:[%s436_s2 + $0x60] sm:$0xff]  ;;  %v72_v4 = vld [vmem:[%s436_s2 + $0x58] sm:$0xff]  ;;  %v36_v6 = vld [vmem:[%s437_s1 + $0x70] sm:$0xff] }
   0x3   :  { %v37_v5 = vld [vmem:[%s437_s1 + $0x78] sm:$0xff]  ;;  %v71_v7 = vld [vmem:[%s436_s2 + $0x50] sm:$0xff]  ;;  %v35_v8 = vld [vmem:[%s437_s1 + $0x68] sm:$0xff] }
   0x4   :  { %78 = vmatpush.msra.mxu1 %v75_v1  ;;  %258 = vmatpush.msra.mxu3 %v75_v1  ;;  %v70_v9 = vld [vmem:[%s436_s2 + $0x48] sm:$0xff]  ;;  %v34_v10 = vld [vmem:[%s437_s1 + $0x60] sm:$0xff]  ;;  %v33_v12 = vld [vmem:[%s437_s1 + $0x58] sm:$0xff] }
   0x5   :  { %38 = vmatpush.msra.mxu0 %v37_v5  ;;  %241 = vmatpush.msra.mxu2 %v37_v5  ;;  %v69_v11 = vld [vmem:[%s436_s2 + $0x40] sm:$0xff]  ;;  %v68_v13 = vld [vmem:[%s436_s2 + $0x38] sm:$0xff]  ;;  %v32_v14 = vld [vmem:[%s437_s1 + $0x50] sm:$0xff] }
   0x6   :  { %79 = vmatpush.msra.mxu1 %v74_v2  ;;  %259 = vmatpush.msra.mxu3 %v74_v2  ;;  %v67_v15 = vld [vmem:[%s436_s2 + $0x30] sm:$0xff]  ;;  %v31_v16 = vld [vmem:[%s437_s1 + $0x48] sm:$0xff]  ;;  %v30_v18 = vld [vmem:[%s437_s1 + $0x40] sm:$0xff] }
   0x7   :  { %39 = vmatpush.msra.mxu0 %v36_v6  ;;  %242 = vmatpush.msra.mxu2 %v36_v6  ;;  %v66_v17 = vld [vmem:[%s436_s2 + $0x28] sm:$0xff]  ;;  %v65_v19 = vld [vmem:[%s436_s2 + $0x20] sm:$0xff]  ;;  %v29_v20 = vld [vmem:[%s437_s1 + $0x38] sm:$0xff] }
   0x8   :  { %80 = vmatpush.msra.mxu1 %v73_v3  ;;  %260 = vmatpush.msra.mxu3 %v73_v3  ;;  %v64_v21 = vld [vmem:[%s436_s2 + $0x18] sm:$0xff]  ;;  %v28_v22 = vld [vmem:[%s437_s1 + $0x30] sm:$0xff]  ;;  %v27_v24 = vld [vmem:[%s437_s1 + $0x28] sm:$0xff] }
   0x9   :  { %40 = vmatpush.msra.mxu0 %v35_v8  ;;  %243 = vmatpush.msra.mxu2 %v35_v8  ;;  %v63_v23 = vld [vmem:[%s436_s2 + $0x10] sm:$0xff]  ;;  %v62_v25 = vld [vmem:[%s436_s2 + $0x8] sm:$0xff]  ;;  %v26_v26 = vld [vmem:[%s437_s1 + $0x20] sm:$0xff] }
   0xa   :  { %81 = vmatpush.msra.mxu1 %v72_v4  ;;  %261 = vmatpush.msra.mxu3 %v72_v4  ;;  %v61_v27 = vld [vmem:[%s436_s2] sm:$0xff]  ;;  %v21_v29 = vld [vmem:[%s439_s0 + $0x8] sm:$0xff]  ;;  %v25_v30 = vld [vmem:[%s437_s1 + $0x18] sm:$0xff] }
   0xb   :  { %41 = vmatpush.msra.mxu0 %v34_v10  ;;  %244 = vmatpush.msra.mxu2 %v34_v10  ;;  %v20_v28 = vld [vmem:[%s439_s0] sm:$0xff]  ;;  %v24_v31 = vld [vmem:[%s437_s1 + $0x10] sm:$0xff]  ;;  %v23_v32 = vld [vmem:[%s437_s1 + $0x8] sm:$0xff] }
   0xc   :  { %82 = vmatpush.msra.mxu1 %v71_v7  ;;  %262 = vmatpush.msra.mxu3 %v71_v7  ;;  %v22_v33 = vld [vmem:[%s437_s1] sm:$0xff] }
   0xd   :  { %42 = vmatpush.msra.mxu0 %v33_v12  ;;  %245 = vmatpush.msra.mxu2 %v33_v12  ;;  %v273_v34 = vld [vmem:[%s438_s4] ss:$0 sm:$0xff] }
   0xe   :  { %83 = vmatpush.msra.mxu1 %v70_v9  ;;  %263 = vmatpush.msra.mxu3 %v70_v9 }
   0xf   :  { %43 = vmatpush.msra.mxu0 %v32_v14  ;;  %246 = vmatpush.msra.mxu2 %v32_v14 }
  0x10   :  { %84 = vmatpush.msra.mxu1 %v69_v11  ;;  %264 = vmatpush.msra.mxu3 %v69_v11 }
  0x11   :  { %44 = vmatpush.msra.mxu0 %v31_v16  ;;  %247 = vmatpush.msra.mxu2 %v31_v16 }
  0x12   :  { %85 = vmatpush.msra.mxu1 %v68_v13  ;;  %265 = vmatpush.msra.mxu3 %v68_v13 }
  0x13   :  { %45 = vmatpush.msra.mxu0 %v30_v18  ;;  %248 = vmatpush.msra.mxu2 %v30_v18 }
  0x14   :  { %86 = vmatpush.msra.mxu1 %v67_v15  ;;  %266 = vmatpush.msra.mxu3 %v67_v15 }
  0x15   :  { %46 = vmatpush.msra.mxu0 %v29_v20  ;;  %249 = vmatpush.msra.mxu2 %v29_v20 }
  0x16   :  { %87 = vmatpush.msra.mxu1 %v66_v17  ;;  %267 = vmatpush.msra.mxu3 %v66_v17 }
  0x17   :  { %47 = vmatpush.msra.mxu0 %v28_v22  ;;  %250 = vmatpush.msra.mxu2 %v28_v22 }
  0x18   :  { %88 = vmatpush.msra.mxu1 %v65_v19  ;;  %268 = vmatpush.msra.mxu3 %v65_v19 }
  0x19   :  { %48 = vmatpush.msra.mxu0 %v27_v24  ;;  %251 = vmatpush.msra.mxu2 %v27_v24 }
  0x1a   :  { %89 = vmatpush.msra.mxu1 %v64_v21  ;;  %269 = vmatpush.msra.mxu3 %v64_v21 }
  0x1b   :  { %49 = vmatpush.msra.mxu0 %v26_v26  ;;  %252 = vmatpush.msra.mxu2 %v26_v26 }
  0x1c   :  { %90 = vmatpush.msra.mxu1 %v63_v23  ;;  %270 = vmatpush.msra.mxu3 %v63_v23 }
  0x1d   :  { %50 = vmatpush.msra.mxu0 %v25_v30  ;;  %253 = vmatpush.msra.mxu2 %v25_v30 }
  0x1e   :  { %91 = vmatpush.msra.mxu1 %v62_v25  ;;  %271 = vmatpush.msra.mxu3 %v62_v25 }
  0x1f   :  { %51 = vmatpush.msra.mxu0 %v24_v31  ;;  %254 = vmatpush.msra.mxu2 %v24_v31 }
  0x20   :  { %92 = vmatpush.msra.mxu1 %v61_v27  ;;  %272 = vmatpush.msra.mxu3 %v61_v27 }
  0x21   :  { %93 = vmatmul.f32.vlgmr.msra.gmra.mxu1 %v20_v28  ;;  %96 = vmatmul.f32.vlgmr.msra.gmra.mxu3 %v21_v29 }
  0x22   :  { %52 = vmatpush.msra.mxu0 %v23_v32  ;;  %255 = vmatpush.msra.mxu2 %v23_v32 }
  0x24   :  { %53 = vmatpush.msra.mxu0 %v22_v33  ;;  %256 = vmatpush.msra.mxu2 %v22_v33 }
  0x25   :  { %54 = vmatmul.f32.vlgmr.msra.gmra.mxu0 %v20_v28  ;;  %57 = vmatmul.f32.vlgmr.msra.gmra.mxu2 %v21_v29 }
  0x9e   :  { %v94_v35 = vpop.f32.mrf.mxu1 }
  0x9f   :  { %v414_v36 = vadd.f32 %v273_v34, %v94_v35 }
  0xa1   :  { %v143_v37 = vmul.f32 0.70710677, %v414_v36 }
  0xa3   :  { %v145_v38 = vmul.f32 %v143_v37, %v143_v37 }
  0xa4   :  { %v97_v39 = vpop.f32.mrf.mxu3 }
  0xa5   :  { %v146_v40 = vmin.f32 %v145_v38, 16.0  ;;  %v417_v41 = vadd.f32 %v273_v34, %v97_v39  ;;  %v274_v38 = vld [vmem:[%s440_s3] ss:$0 sm:$0xff] }
  0xa7   :  { %v147_v42 = vmul.f32 2.1237322e-06, %v146_v40  ;;  %v158_v43 = vmul.f32 3.8918573e-05, %v146_v40  ;;  %v420_v44 = vmul.f32 0.70710677, %v417_v41 }
  0xa9   :  { %v148_v45 = vadd.f32 0.00028619796, %v147_v42  ;;  %v159_v46 = vadd.f32 0.001143296, %v158_v43  ;;  %v185_v47 = vmul.f32 %v420_v44, %v420_v44  ;;  %v55_v43 = vpop.f32.mrf.mxu0 }
  0xab   :  { %v149_v48 = vmul.f32 %v148_v45, %v146_v40  ;;  %v160_v49 = vmul.f32 %v159_v46, %v146_v40  ;;  %v186_v50 = vmin.f32 %v185_v47, 16.0 }
  0xad   :  { %v161_v51 = vadd.f32 0.014752088, %v160_v49  ;;  %v150_v52 = vadd.f32 0.0036580483, %v149_v48  ;;  %v187_v53 = vmul.f32 2.1237322e-06, %v186_v50  ;;  %v108_v48 = vadd.f32 %v274_v38, %v55_v43 }
  0xae   :  { %v198_v54 = vmul.f32 3.8918573e-05, %v186_v50 }
  0xaf   :  { %v162_v55 = vmul.f32 %v161_v51, %v146_v40  ;;  %v188_v56 = vadd.f32 0.00028619796, %v187_v53  ;;  %v151_v59 = vmul.f32 %v150_v52, %v146_v40 }
  0xb0   :  { %v199_v57 = vadd.f32 0.001143296, %v198_v54 }
  0xb1   :  { %v163_v58 = vadd.f32 0.112945676, %v162_v55  ;;  %v189_v60 = vmul.f32 %v188_v56, %v186_v50  ;;  %v152_v2 = vadd.f32 0.05243302, %v151_v59  ;;  %v58_v56 = vpop.f32.mrf.mxu2 }
  0xb2   :  { %v200_v61 = vmul.f32 %v199_v57, %v186_v50 }
  0xb3   :  { %v164_v62 = vmul.f32 %v163_v58, %v146_v40  ;;  %v190_v1 = vadd.f32 0.0036580483, %v189_v60  ;;  %v153_v8 = vmul.f32 %v152_v2, %v146_v40  ;;  %v109_v58 = vadd.f32 %v274_v38, %v58_v56 }
  0xb4   :  { %v201_v63 = vadd.f32 0.014752088, %v200_v61 }
  0xb5   :  { %v165_v0 = vadd.f32 0.4994258, %v164_v62  ;;  %v191_v7 = vmul.f32 %v190_v1, %v186_v50  ;;  %v154_v12 = vadd.f32 0.18741608, %v153_v8 }
  0xb6   :  { %v202_v3 = vmul.f32 %v201_v63, %v186_v50 }
  0xb7   :  { %v166_v4 = vmul.f32 %v165_v0, %v146_v40  ;;  %v192_v11 = vadd.f32 0.05243302, %v191_v7  ;;  %v155_v17 = vmul.f32 %v154_v12, %v146_v40 }
  0xb8   :  { %v203_v5 = vadd.f32 0.112945676, %v202_v3 }
  0xb9   :  { %v167_v6 = vadd.f32 1.0, %v166_v4  ;;  %v193_v16 = vmul.f32 %v192_v11, %v186_v50  ;;  %v156_v22 = vadd.f32 1.1283791, %v155_v17 }
  0xba   :  { %v204_v9 = vmul.f32 %v203_v5, %v186_v50 }
  0xbb   :  { %275 = vrcp.f32 %v167_v6  ;;  %v179_v20 = vand.u32 2147483648, %v167_v6  ;;  %v194_v21 = vadd.f32 0.18741608, %v193_v16  ;;  %v177_v24 = vand.u32 2147483647, %v167_v6 }
  0xbc   :  { %v205_v10 = vadd.f32 0.4994258, %v204_v9  ;;  %vm173_vm1 = vweird.f32 %v167_v6  ;;  %v157_v30 = vmul.f32 %v156_v22, %v143_v37  ;;  %v141_v37 = vmul.f32 0.5, %v414_v36 }
  0xbd   :  { %v180_v27 = vor.u32 1.1754944e-38, %v179_v20  ;;  %v195_v28 = vmul.f32 %v194_v21, %v186_v50  ;;  %vm178_vm3 = vcmp.eq.f32.partialorder %v177_v24, 8.507059e+37  ;;  %v142_v36 = vmul.f32 0.5, %v417_v41 }
  0xbe   :  { %v206_v13 = vmul.f32 %v205_v10, %v186_v50 }
  0xbf   :  { %v196_v39 = vadd.f32 1.1283791, %v195_v28 }
  0xc0   :  { %v207_v14 = vadd.f32 1.0, %v206_v13 }
  0xc1   :  { %v276_v15 = vpop.eup %275  ;;  %v197_v50 = vmul.f32 %v196_v39, %v420_v44 }
  0xc2   :  { %v169_v18 = vmul.f32 %v276_v15, %v167_v6  ;;  %277 = vrcp.f32 %v207_v14  ;;  %vm174_vm0 = vweird.f32 %v276_v15  ;;  %v219_v35 = vand.u32 2147483648, %v207_v14 }
  0xc3   :  { %vm175_vm2 = vmor %vm173_vm1, %vm174_vm0  ;;  %v217_v42 = vand.u32 2147483647, %v207_v14  ;;  %vm213_vm5 = vweird.f32 %v207_v14 }
  0xc4   :  { %v170_v19 = vsub.f32 1.0, %v169_v18  ;;  %v220_v47 = vor.u32 1.1754944e-38, %v219_v35 }
  0xc5   :  { %vm218_vm7 = vcmp.eq.f32.partialorder %v217_v42, 8.507059e+37 }
  0xc6   :  { %v171_v23 = vmul.f32 %v276_v15, %v170_v19 }
  0xc8   :  { %v278_v25 = vpop.eup %277  ;;  %v172_v26 = vadd.f32 %v276_v15, %v171_v23 }
  0xc9   :  { %v209_v29 = vmul.f32 %v278_v25, %v207_v14  ;;  %vm214_vm4 = vweird.f32 %v278_v25 }
  0xca   :  { %v176_v31 = vsel %vm175_vm2, %v276_v15, %v172_v26  ;;  %vm215_vm6 = vmor %vm213_vm5, %vm214_vm4 }
  0xcb   :  { %v181_v32 = vsel %vm178_vm3, %v180_v27, %v176_v31  ;;  %v210_v33 = vsub.f32 1.0, %v209_v29 }
  0xcc   :  { %v182_v34 = vmul.f32 %v181_v32, %v157_v30 }
  0xcd   :  { %v211_v40 = vmul.f32 %v278_v25, %v210_v33 }
  0xce   :  { %v239_v45 = vclamps-f32 %v182_v34, 1.0 }
  0xcf   :  { %v212_v46 = vadd.f32 %v278_v25, %v211_v40 }
  0xd0   :  { %v225_v49 = vadd.f32 1.0, %v239_v45 }
  0xd1   :  { %v216_v51 = vsel %vm215_vm6, %v278_v25, %v212_v46 }
  0xd2   :  { %v221_v52 = vsel %vm218_vm7, %v220_v47, %v216_v51  ;;  %v227_v53 = vmul.f32 %v225_v49, %v141_v37 }
  0xd3   :  { %v222_v54 = vmul.f32 %v221_v52, %v197_v50 }
  0xd4   :  { %v231_v55 = vmul.f32 %v227_v53, %v108_v48 }
  0xd5   :  { %v240_v57 = vclamps-f32 %v222_v54, 1.0 }
  0xd6   :  { %233 = vst [vmem:[%s441_s5] sm:$0xff] %v231_v55 }
  0xd7   :  { %v226_v59 = vadd.f32 1.0, %v240_v57 }
  0xd9   :  { %v228_v60 = vmul.f32 %v226_v59, %v142_v36 }
  0xdb   :  { %v232_v61 = vmul.f32 %v228_v60, %v109_v58 }
  0xdd   :  { %234 = vst [vmem:[%s441_s5 + $0x8] sm:$0xff] %v232_v61 }

</bundles_post_ra>
